<compile_context>
chip_gen: v5e
topology: v5e:2x2
jax: 0.10.0
libtpu: 0.0.40
codegen_flags: <defaults>
</compile_context>

<pallas_src>
import jax
import jax.numpy as jnp
from jax.experimental import pallas as pl
from jax.experimental.pallas import tpu as pltpu


def _ppo_forward_kernel(xt_ref, w1_ref, b1_ref, w2_ref, b2_ref,
                        wh_ref, bh_ref, out_ref):
    """Batch-on-lanes forward.

    xt_ref : (D, tm)      x transposed, batch on the lane axis
    w1_ref : (H, D)       b1_ref: (H, 1)
    w2_ref : (H, H)       b2_ref: (H, 1)
    wh_ref : (A+1, H)     bh_ref: (A+1, 1)   fused [policy_mean; value]
    out_ref: (A+1, tm)    fused [action_mean; value], batch on lanes
    """
    xt = xt_ref[...]

    # feature_extractor: Linear -> ReLU -> Linear -> ReLU (transposed form:
    # y^T = W @ x^T + b, with W already stored (out, in) like nn.Linear).
    h1 = jnp.maximum(
        jnp.dot(w1_ref[...], xt, preferred_element_type=jnp.float32)
        + b1_ref[...], 0.0)
    feats = jnp.maximum(
        jnp.dot(w2_ref[...], h1, preferred_element_type=jnp.float32)
        + b2_ref[...], 0.0)

    # torch: nan_to_num(features, nan=0.0) only runs when a NaN is present;
    # unconditional NaN->0 is element-wise identical for NaNs.
    # TODO(synk): torch's conditional call would *also* clamp +/-inf, but only
    # when a NaN coexists in the tensor; that data-dependent coupling is not
    # replicated here.
    feats = jnp.where(jnp.isnan(feats), 0.0, feats)

    # Fused policy_mean + value head: one MXU issue, one lane-dense store.
    heads = (jnp.dot(wh_ref[...], feats, preferred_element_type=jnp.float32)
             + bh_ref[...])
    # torch.nan_to_num defaults: nan->0.0, +inf->max finite, -inf->min finite.
    out_ref[...] = jnp.nan_to_num(heads, nan=0.0).astype(out_ref.dtype)


def _batch_tile(batch, max_tile=8192):
    """Lane-axis tile: a multiple of 128 (or the full batch when small).

    Keeps >= 2 tiles when the batch allows so both v7x TensorCores get work;
    caps at `max_tile` so per-step VMEM stays tiny (x tile at 8192 lanes is
    only 512 KiB f32 in the lane-dense layout)."""
    if batch <= 256:
        return batch                                   # single full-dim block
    half = pl.cdiv(pl.cdiv(batch, 2), 128) * 128       # ~B/2, 128-aligned
    return max(128, min((max_tile // 128) * 128, half))


def ppo_forward(x, packed, *, max_batch_tile=8192):
    """PPONetwork forward. Returns (action_mean, policy_std, value).

    `packed` must come from pack_params() (done once at init, not per call).
    NOTE: x is transposed here to the lane-dense (D, B) layout; if the caller
    can produce x already as (D, B), pass it pre-transposed upstream to avoid
    this small copy.
    """
    B, D = x.shape
    H = packed["w1"].shape[0]
    n_out = packed["wh"].shape[0]          # A + 1
    A = n_out - 1

    xt = x.T                               # (D, B): batch on lanes

    tm = _batch_tile(B, max_batch_tile)
    n_tiles = pl.cdiv(B, tm)
    b_eff = n_tiles * tm                   # tile-rounded traffic (last block masked)

    flops = 2 * b_eff * (D * H + H * H + H * n_out)
    bytes_accessed = 4 * (D * b_eff + n_out * b_eff
                          + H * D + H * H + n_out * H + 2 * H + n_out)

    out_t = pl.pallas_call(
        _ppo_forward_kernel,
        out_shape=jax.ShapeDtypeStruct((n_out, B), jnp.float32),
        grid=(n_tiles,),
        in_specs=[
            pl.BlockSpec((D, tm), lambda i: (0, i)),        # x^T tile (streamed)
            pl.BlockSpec((H, D), lambda i: (0, 0)),         # w1 (resident)
            pl.BlockSpec((H, 1), lambda i: (0, 0)),         # b1
            pl.BlockSpec((H, H), lambda i: (0, 0)),         # w2 (resident)
            pl.BlockSpec((H, 1), lambda i: (0, 0)),         # b2
            pl.BlockSpec((n_out, H), lambda i: (0, 0)),     # [wm; wv] (resident)
            pl.BlockSpec((n_out, 1), lambda i: (0, 0)),     # [bm; bv]
        ],
        out_specs=pl.BlockSpec((n_out, tm), lambda i: (0, i)),
        compiler_params=pltpu.CompilerParams(
            dimension_semantics=("parallel",)),
        cost_estimate=pl.CostEstimate(
            flops=flops, transcendentals=0, bytes_accessed=bytes_accessed),
    )(xt, packed["w1"], packed["b1"], packed["w2"], packed["b2"],
      packed["wh"], packed["bh"])

    action_mean = out_t[:A, :].T           # (B, A)
    value = out_t[A:, :].T                 # (B, 1)
    # policy_std is returned as-is by the PyTorch forward (a Parameter).
    return action_mean, packed["policy_std"], value


def init_params(key, input_dim, hidden_dim, action_dim):
    """Synthetic params in PyTorch nn.Linear layout: weight (out, in), bias (out,)."""
    ks = jax.random.split(key, 8)

    def lin(kw, kb, fan_in, fan_out):
        bound = 1.0 / (fan_in ** 0.5)
        w = jax.random.uniform(kw, (fan_out, fan_in), jnp.float32, -bound, bound)
        b = jax.random.uniform(kb, (fan_out,), jnp.float32, -bound, bound)
        return w, b

    w1, b1 = lin(ks[0], ks[1], input_dim, hidden_dim)
    w2, b2 = lin(ks[2], ks[3], hidden_dim, hidden_dim)
    wm, bm = lin(ks[4], ks[5], hidden_dim, action_dim)
    wv, bv = lin(ks[6], ks[7], hidden_dim, 1)
    policy_std = jnp.ones((action_dim,), jnp.float32) * 0.1

    return {
        "w1": w1, "b1": b1,
        "w2": w2, "b2": b2,
        "wm": wm, "bm": bm,
        "wv": wv, "bv": bv,
        "policy_std": policy_std,
    }


def pack_params(p):
    """One-time packing (at init, NOT per forward):
       * biases reshaped to (out, 1) columns (lane-broadcast in the kernel),
       * policy_mean and value heads fused into one (A+1, H) matmul."""
    return {
        "w1": p["w1"], "b1": p["b1"].reshape(-1, 1),
        "w2": p["w2"], "b2": p["b2"].reshape(-1, 1),
        "wh": jnp.concatenate([p["wm"], p["wv"]], axis=0),
        "bh": jnp.concatenate([p["bm"], p["bv"]], axis=0).reshape(-1, 1),
        "policy_std": p["policy_std"],
    }


def _ref(x, p):
    """Pure-JAX reference in PyTorch layout (y = x @ W.T + b)."""
    h1 = jnp.maximum(x @ p["w1"].T + p["b1"], 0.0)
    f = jnp.maximum(h1 @ p["w2"].T + p["b2"], 0.0)
    f = jnp.where(jnp.isnan(f), 0.0, f)
    am = jnp.nan_to_num(f @ p["wm"].T + p["bm"], nan=0.0)
    v = jnp.nan_to_num(f @ p["wv"].T + p["bv"], nan=0.0)
    return am, v


if __name__ == "__main__":
    # Small shapes consistent with the module: batch=8, input_dim=16,
    # hidden_dim=32, action_dim=4.
    B, D_IN, HID, A = 8, 16, 32, 4

    key = jax.random.PRNGKey(0)
    k_x, k_p, k_x2 = jax.random.split(key, 3)

    x = jax.random.normal(k_x, (B, D_IN), jnp.float32)
    params = init_params(k_p, D_IN, HID, A)
    packed = pack_params(params)           # pack once, reuse every forward

    action_mean, policy_std, value = ppo_forward(x, packed)
    jax.block_until_ready((action_mean, policy_std, value))

    am_ref, v_ref = _ref(x, params)
    assert action_mean.shape == (B, A)
    assert value.shape == (B, 1)
    assert policy_std.shape == (A,)
    assert jnp.allclose(action_mean, am_ref, atol=1e-5, rtol=1e-5)
    assert jnp.allclose(value, v_ref, atol=1e-5, rtol=1e-5)

    # Also exercise the multi-tile path (grid=2, ragged last block, both v7x
    # TensorCores active) to verify the lane-dense batch grid.
    B2 = 1040
    x2 = jax.random.normal(k_x2, (B2, D_IN), jnp.float32)
    am2, _, v2 = ppo_forward(x2, packed)
    jax.block_until_ready((am2, v2))
    am2_ref, v2_ref = _ref(x2, params)
    assert am2.shape == (B2, A) and v2.shape == (B2, 1)
    assert jnp.allclose(am2, am2_ref, atol=1e-5, rtol=1e-5)
    assert jnp.allclose(v2, v2_ref, atol=1e-5, rtol=1e-5)

    print("KERNEL_OK")
</pallas_src>

<mosaic_0001>
module attributes {stable_mosaic.version = 11 : i64} {
  func.func @_ppo_forward_kernel(%arg0: i32, %arg1: memref<16x8xf32, #tpu.memory_space<vmem>>, %arg2: memref<32x16xf32, #tpu.memory_space<vmem>>, %arg3: memref<32x1xf32, #tpu.memory_space<vmem>>, %arg4: memref<32x32xf32, #tpu.memory_space<vmem>>, %arg5: memref<32x1xf32, #tpu.memory_space<vmem>>, %arg6: memref<5x32xf32, #tpu.memory_space<vmem>>, %arg7: memref<5x1xf32, #tpu.memory_space<vmem>>, %arg8: memref<5x8xf32, #tpu.memory_space<vmem>>) attributes {dimension_semantics = [#tpu.dimension_semantics<parallel>], iteration_bounds = array<i64: 1>, scalar_prefetch = 0 : i64, scratch_operands = 0 : i64, tpu.core_type = #tpu.core_type<tc>, window_params = [{transform_indices = @transform_0, window_bounds = array<i64: 16, 8>}, {pipeline_mode = #tpu.pipeline_mode<synchronous>, transform_indices = @transform_1, window_bounds = array<i64: 32, 16>}, {pipeline_mode = #tpu.pipeline_mode<synchronous>, transform_indices = @transform_2, window_bounds = array<i64: 32, 1>}, {pipeline_mode = #tpu.pipeline_mode<synchronous>, transform_indices = @transform_3, window_bounds = array<i64: 32, 32>}, {pipeline_mode = #tpu.pipeline_mode<synchronous>, transform_indices = @transform_4, window_bounds = array<i64: 32, 1>}, {pipeline_mode = #tpu.pipeline_mode<synchronous>, transform_indices = @transform_5, window_bounds = array<i64: 5, 32>}, {pipeline_mode = #tpu.pipeline_mode<synchronous>, transform_indices = @transform_6, window_bounds = array<i64: 5, 1>}, {transform_indices = @transform_7, window_bounds = array<i64: 5, 8>}]} {
    %c0 = arith.constant 0 : index
    %c0_0 = arith.constant 0 : index
    %0 = vector.load %arg1[%c0, %c0_0] : memref<16x8xf32, #tpu.memory_space<vmem>>, vector<16x8xf32>
    %c0_1 = arith.constant 0 : index
    %c0_2 = arith.constant 0 : index
    %1 = vector.load %arg2[%c0_1, %c0_2] : memref<32x16xf32, #tpu.memory_space<vmem>>, vector<32x16xf32>
    %cst = arith.constant dense<0.000000e+00> : vector<32x8xf32>
    %2 = tpu.matmul %1, %0, %cst {dimension_numbers = #tpu.dot_dimension_numbers<[1], [0], [0], [1], [0, 0, 1, 1], [], []>} : vector<32x16xf32>, vector<16x8xf32>, vector<32x8xf32> -> vector<32x8xf32>
    %c0_3 = arith.constant 0 : index
    %c0_4 = arith.constant 0 : index
    %3 = vector.load %arg3[%c0_3, %c0_4] : memref<32x1xf32, #tpu.memory_space<vmem>>, vector<32x1xf32>
    %4 = vector.broadcast %3 : vector<32x1xf32> to vector<32x8xf32>
    %5 = arith.addf %2, %4 : vector<32x8xf32>
    %cst_5 = arith.constant 0.000000e+00 : f32
    %6 = vector.broadcast %cst_5 : f32 to vector<32x8xf32>
    %7 = arith.maximumf %5, %6 : vector<32x8xf32>
    %c0_6 = arith.constant 0 : index
    %c0_7 = arith.constant 0 : index
    %8 = vector.load %arg4[%c0_6, %c0_7] : memref<32x32xf32, #tpu.memory_space<vmem>>, vector<32x32xf32>
    %cst_8 = arith.constant dense<0.000000e+00> : vector<32x8xf32>
    %9 = tpu.matmul %8, %7, %cst_8 {dimension_numbers = #tpu.dot_dimension_numbers<[1], [0], [0], [1], [0, 0, 1, 1], [], []>} : vector<32x32xf32>, vector<32x8xf32>, vector<32x8xf32> -> vector<32x8xf32>
    %c0_9 = arith.constant 0 : index
    %c0_10 = arith.constant 0 : index
    %10 = vector.load %arg5[%c0_9, %c0_10] : memref<32x1xf32, #tpu.memory_space<vmem>>, vector<32x1xf32>
    %11 = vector.broadcast %10 : vector<32x1xf32> to vector<32x8xf32>
    %12 = arith.addf %9, %11 : vector<32x8xf32>
    %cst_11 = arith.constant 0.000000e+00 : f32
    %13 = vector.broadcast %cst_11 : f32 to vector<32x8xf32>
    %14 = arith.maximumf %12, %13 : vector<32x8xf32>
    %15 = arith.cmpf one, %14, %14 : vector<32x8xf32>
    %cst_12 = arith.constant 0.000000e+00 : f32
    %16 = vector.broadcast %cst_12 : f32 to vector<32x8xf32>
    %17 = arith.select %15, %16, %14 : vector<32x8xi1>, vector<32x8xf32>
    %c0_13 = arith.constant 0 : index
    %c0_14 = arith.constant 0 : index
    %18 = vector.load %arg6[%c0_13, %c0_14] : memref<5x32xf32, #tpu.memory_space<vmem>>, vector<5x32xf32>
    %cst_15 = arith.constant dense<0.000000e+00> : vector<5x8xf32>
    %19 = tpu.matmul %18, %17, %cst_15 {dimension_numbers = #tpu.dot_dimension_numbers<[1], [0], [0], [1], [0, 0, 1, 1], [], []>} : vector<5x32xf32>, vector<32x8xf32>, vector<5x8xf32> -> vector<5x8xf32>
    %c0_16 = arith.constant 0 : index
    %c0_17 = arith.constant 0 : index
    %20 = vector.load %arg7[%c0_16, %c0_17] : memref<5x1xf32, #tpu.memory_space<vmem>>, vector<5x1xf32>
    %21 = vector.broadcast %20 : vector<5x1xf32> to vector<5x8xf32>
    %22 = arith.addf %19, %21 : vector<5x8xf32>
    %cst_18 = arith.constant 0.000000e+00 : f32
    %23 = arith.cmpf one, %22, %22 : vector<5x8xf32>
    %24 = vector.broadcast %cst_18 : f32 to vector<5x8xf32>
    %25 = arith.select %23, %24, %22 : vector<5x8xi1>, vector<5x8xf32>
    %cst_19 = arith.constant 0x7F800000 : f32
    %26 = vector.broadcast %cst_19 : f32 to vector<5x8xf32>
    %27 = arith.cmpf oeq, %25, %26 : vector<5x8xf32>
    %cst_20 = arith.constant 3.40282347E+38 : f32
    %28 = vector.broadcast %cst_20 : f32 to vector<5x8xf32>
    %29 = arith.select %27, %28, %25 : vector<5x8xi1>, vector<5x8xf32>
    %cst_21 = arith.constant 0xFF800000 : f32
    %30 = vector.broadcast %cst_21 : f32 to vector<5x8xf32>
    %31 = arith.cmpf oeq, %29, %30 : vector<5x8xf32>
    %cst_22 = arith.constant -3.40282347E+38 : f32
    %32 = vector.broadcast %cst_22 : f32 to vector<5x8xf32>
    %33 = arith.select %31, %32, %29 : vector<5x8xi1>, vector<5x8xf32>
    %c0_23 = arith.constant 0 : index
    %c0_24 = arith.constant 0 : index
    %34 = vector.load %arg8[%c0_23, %c0_24] : memref<5x8xf32, #tpu.memory_space<vmem>>, vector<5x8xf32>
    tpu.vector_store %arg8[%c0_23, %c0_24], %33 {strides = array<i32>} : memref<5x8xf32, #tpu.memory_space<vmem>>, vector<5x8xf32>,
    return
  }
  func.func @transform_0(%arg0: i32) -> (i32, i32) {
    %c0_i32 = arith.constant 0 : i32
    %c0_i32_0 = arith.constant 0 : i32
    return %c0_i32, %arg0 : i32, i32
  }
  func.func @transform_1(%arg0: i32) -> (i32, i32) {
    %c0_i32 = arith.constant 0 : i32
    %c0_i32_0 = arith.constant 0 : i32
    %c0_i32_1 = arith.constant 0 : i32
    return %c0_i32, %c0_i32_0 : i32, i32
  }
  func.func @transform_2(%arg0: i32) -> (i32, i32) {
    %c0_i32 = arith.constant 0 : i32
    %c0_i32_0 = arith.constant 0 : i32
    %c0_i32_1 = arith.constant 0 : i32
    return %c0_i32, %c0_i32_0 : i32, i32
  }
  func.func @transform_3(%arg0: i32) -> (i32, i32) {
    %c0_i32 = arith.constant 0 : i32
    %c0_i32_0 = arith.constant 0 : i32
    %c0_i32_1 = arith.constant 0 : i32
    return %c0_i32, %c0_i32_0 : i32, i32
  }
  func.func @transform_4(%arg0: i32) -> (i32, i32) {
    %c0_i32 = arith.constant 0 : i32
    %c0_i32_0 = arith.constant 0 : i32
    %c0_i32_1 = arith.constant 0 : i32
    return %c0_i32, %c0_i32_0 : i32, i32
  }
  func.func @transform_5(%arg0: i32) -> (i32, i32) {
    %c0_i32 = arith.constant 0 : i32
    %c0_i32_0 = arith.constant 0 : i32
    %c0_i32_1 = arith.constant 0 : i32
    return %c0_i32, %c0_i32_0 : i32, i32
  }
  func.func @transform_6(%arg0: i32) -> (i32, i32) {
    %c0_i32 = arith.constant 0 : i32
    %c0_i32_0 = arith.constant 0 : i32
    %c0_i32_1 = arith.constant 0 : i32
    return %c0_i32, %c0_i32_0 : i32, i32
  }
  func.func @transform_7(%arg0: i32) -> (i32, i32) {
    %c0_i32 = arith.constant 0 : i32
    %c0_i32_0 = arith.constant 0 : i32
    return %c0_i32, %arg0 : i32, i32
  }
}

</mosaic_0001>

<bundles_post_ra>
// kernel: tpu_custom_call.1
= control target key start
LH: loop header
LB: loop body
LE: loop exit
PB: predicated region body
PF: predicated region fallthrough
CT: control target
= control target key end

     0   :  { %vm57_vm0 = vcmask 130048   ;;  %v297_v3 = vmov 0   ;;  %s411_s0 = inlined_call_operand.vmem [shape: f32[16,8], index: 0, kind: input, shape index: {}]   ;;  %s412_s1 = inlined_call_operand.vmem [shape: f32[32,16], index: 1, kind: input, shape index: {}]   ;;  %s413_s2 = inlined_call_operand.vmem [shape: f32[32,1], index: 2, kind: input, shape index: {}]   ;;  %s414_s3 = inlined_call_operand.vmem [shape: f32[32,32], index: 3, kind: input, shape index: {}]   ;;  %s415_s4 = inlined_call_operand.vmem [shape: f32[32,1], index: 4, kind: input, shape index: {}]   ;;  %s416_s5 = inlined_call_operand.vmem [shape: f32[5,32], index: 5, kind: input, shape index: {}]   ;;  %s417_s6 = inlined_call_operand.vmem [shape: f32[5,1], index: 6, kind: input, shape index: {}]   ;;  %s418_s7 = inlined_call_operand.hbm [shape: f32[5,8], index: 7, kind: output, shape index: {}]  }
   0x1   :  { %v28_v0 = vld [vmem:[%s411_s0 + $0x8] sm:$0xff]  ;;  %v27_v1 = vld [vmem:[%s411_s0] sm:$0xff]  ;;  %269 = vset.pattern.permute.xlu1 %v297_v3  ;;  %v36_v4 = vld [vmem:[%s413_s2 + $0x18] sm:$0xff]  ;;  %268 = vset.pattern.permute.xlu0 %v297_v3 }
   0x2   :  { %84 = vmatpush.msra.mxu0 %v28_v0  ;;  %v29_v2 = vld [vmem:[%s412_s1] sm:$0xff]  ;;  %v34_v5 = vld [vmem:[%s413_s2 + $0x8] sm:$0xff]  ;;  %54 = vperm.xlu0 %268, %v36_v4   ;;  %v32_v6 = vld [vmem:[%s412_s1 + $0x18] sm:$0xff] }
   0x3   :  { %44 = vperm.xlu1 %269, %v34_v5   ;;  %256 = vmatpush.msra.mxu1 %v28_v0 }
   0x4   :  { %85 = vmatpush.msra.mxu0 %v27_v1 }
   0x5   :  { %239 = vmatmul.msk.f32.vlgmr.msra.gmra.mxu0 %vm57_vm0, %v29_v2 }
   0x6   :  { %12 = vsyncpa [#allocation3], 0  ;;  %270 = vset.pattern.permute.xlu2 %v297_v3  ;;  %257 = vmatpush.msra.mxu1 %v27_v1  ;;  %v33_v7 = vld [vmem:[%s413_s2] sm:$0xff]  ;;  %v35_v8 = vld [vmem:[%s413_s2 + $0x10] sm:$0xff]  ;;  %vm131_vm1 = vcmask 261120   ;;  %s298_s11 = smov [#allocation2]  }
   0x7   :  { %242 = vmatmul.msk.f32.vlgmr.msra.gmra.mxu1 %vm57_vm0, %v32_v6  ;;  %v30_v9 = vld [vmem:[%s412_s1 + $0x8] sm:$0xff]  ;;  %v107_v10 = vld [vmem:[%s415_s4] sm:$0xff]  ;;  %v31_v12 = vld [vmem:[%s412_s1 + $0x10] sm:$0xff]  ;;  %s228_s12 = sshll.u32 %s298_s11, 4  ;;  %s230_s15 = sshll.u32 %s418_s7, 4  ;;  %vm221_vm12 = vcmask 61440   ;;  %s229_s12 = int_to_ptr.vmem [resolvable:$true] %s228_s12  ;;  %s231_s15 = int_to_ptr.hbm [resolvable:$true] %s230_s15 }
   0x8   :  { %v108_v11 = vld [vmem:[%s415_s4 + $0x8] sm:$0xff]  ;;  %v110_v16 = vld [vmem:[%s415_s4 + $0x18] sm:$0xff]  ;;  %v109_v21 = vld [vmem:[%s415_s4 + $0x10] sm:$0xff] }
   0x9   :  { %128 = vperm.xlu2 %270, %v110_v16   ;;  %v186_v27 = vld [vmem:[%s417_s6] sm:$0x1f]  ;;  %v104_v33 = vld [vmem:[%s414_s3 + $0x8] sm:$0xff]  ;;  %v105_v34 = vld [vmem:[%s414_s3 + $0x10] sm:$0xff] }
   0xa   :  { %49 = vperm.xlu0 %268, %v35_v8   ;;  %v103_v32 = vld [vmem:[%s414_s3] sm:$0xff]  ;;  %v106_v35 = vld [vmem:[%s414_s3 + $0x18] sm:$0xff] }
   0xb   :  { %39 = vperm.xlu1 %269, %v33_v7   ;;  %v185_v52 = vld [vmem:[%s416_s5] sm:$0x1f] }
   0xd   :  { %240 = vmatmul.msk.f32.gmra.mxu0 %vm57_vm0, %v30_v9 }
  0x11   :  { %123 = vperm.xlu2 %270, %v109_v21  }
  0x12   :  { %118 = vperm.xlu0 %268, %v108_v11  }
  0x13   :  { %113 = vperm.xlu1 %269, %v107_v10  }
  0x15   :  { %241 = vmatmul.msk.f32.gmra.mxu0 %vm57_vm0, %v31_v12 }
  0x19   :  { %189 = vperm.xlu2 %270, %v186_v27  }
  0x63   :  { %v129_v36 = vpop.permute.xlu2 %128 }
  0x6b   :  { %v124_v38 = vpop.permute.xlu2 %123 }
  0x73   :  { %v190_v53 = vpop.permute.xlu2 %189 }
  0x74   :  { %v55_v14 = vpop.permute.xlu0 %54 }
  0x75   :  { %v45_v18 = vpop.permute.xlu1 %44 }
  0x7c   :  { %v50_v23 = vpop.permute.xlu0 %49 }
  0x7d   :  { %v40_v22 = vpop.permute.xlu1 %39 }
  0x82   :  { %v87_v13 = vpop.f32.mrf.mxu0 }
  0x83   :  { %v88_v28 = vadd.f32 %v87_v13, %v40_v22 }
  0x84   :  { %v96_v15 = vpop.f32.mrf.mxu1  ;;  %v119_v41 = vpop.permute.xlu0 %118 }
  0x85   :  { %v97_v17 = vadd.f32 %v96_v15, %v55_v14  ;;  %v99_v31 = vmax.f32 %v88_v28, 0.0  ;;  %v114_v44 = vpop.permute.xlu1 %113 }
  0x87   :  { %v102_v19 = vmax.f32 %v97_v17, 0.0 }
  0x89   :  { %156 = vmatpush.msrb.mxu1 %v102_v19  ;;  %258 = vmatpush.msra.mxu2 %v102_v19 }
  0x8a   :  { %v90_v20 = vpop.f32.mrf.mxu0  ;;  %259 = vmatpush.msra.mxu3 %v102_v19 }
  0x8b   :  { %v91_v25 = vadd.f32 %v90_v20, %v45_v18 }
  0x8d   :  { %v100_v30 = vmax.f32 %v91_v25, 0.0 }
  0x92   :  { %v93_v24 = vpop.f32.mrf.mxu0 }
  0x93   :  { %v94_v26 = vadd.f32 %v93_v24, %v50_v23 }
  0x95   :  { %v101_v29 = vmax.f32 %v94_v26, 0.0 }
  0x97   :  { %157 = vmatpush.msrb.mxu1 %v101_v29  ;;  %260 = vmatpush.msra.mxu2 %v101_v29 }
  0x98   :  { %261 = vmatpush.msra.mxu3 %v101_v29 }
  0x99   :  { %158 = vmatpush.msrb.mxu1 %v100_v30  ;;  %262 = vmatpush.msra.mxu2 %v100_v30 }
  0x9a   :  { %263 = vmatpush.msra.mxu3 %v100_v30 }
  0x9b   :  { %159 = vmatpush.msrb.mxu1 %v99_v31  ;;  %264 = vmatpush.msra.mxu2 %v99_v31 }
  0x9c   :  { %265 = vmatpush.msra.mxu3 %v99_v31  ;;  %243 = vmatmul.msk.f32.vlgmr.msrb.gmra.mxu1 %vm131_vm1, %v103_v32 }
  0x9d   :  { %244 = vmatmul.msk.f32.vlgmr.msra.gmra.mxu2 %vm131_vm1, %v104_v33  ;;  %245 = vmatmul.msk.f32.vlgmr.msra.gmra.mxu3 %vm131_vm1, %v105_v34 }
  0xa5   :  { %246 = vmatmul.msk.f32.gmra.mxu3 %vm131_vm1, %v106_v35 }
 0x119   :  { %v161_v42 = vpop.f32.mrf.mxu1 }
 0x11a   :  { %v162_v46 = vadd.f32 %v161_v42, %v114_v44 }
 0x11c   :  { %v173_v51 = vmax.f32 %v162_v46, 0.0 }
 0x11e   :  { %vm177_vm7 = vcmp.ne.f32.partialorder %v173_v51, %v173_v51 }
 0x11f   :  { %vm253_vm9 = vmneg %vm177_vm7 }
 0x120   :  { %v167_v37 = vpop.f32.mrf.mxu3  ;;  %v164_v39 = vpop.f32.mrf.mxu2 }
 0x121   :  { %v168_v40 = vadd.f32 %v167_v37, %v124_v38  ;;  %v165_v43 = vadd.f32 %v164_v39, %v119_v41 }
 0x123   :  { %v175_v47 = vmax.f32 %v168_v40, 0.0  ;;  %v174_v49 = vmax.f32 %v165_v43, 0.0 }
 0x125   :  { %vm179_vm3 = vcmp.ne.f32.partialorder %v175_v47, %v175_v47  ;;  %vm178_vm5 = vcmp.ne.f32.partialorder %v174_v49, %v174_v49 }
 0x126   :  { %vm249_vm6 = vmneg %vm179_vm3 }
 0x127   :  { %vm251_vm8 = vmneg %vm178_vm5 }
 0x128   :  { %v170_v45 = vpop.f32.mrf.mxu3 }
 0x129   :  { %v171_v48 = vadd.f32 %v170_v45, %v129_v36 }
 0x12b   :  { %v176_v50 = vmax.f32 %v171_v48, 0.0 }
 0x12d   :  { %vm180_vm2 = vcmp.ne.f32.partialorder %v176_v50, %v176_v50 }
 0x12e   :  { %vm247_vm4 = vmneg %vm180_vm2 }
 0x12f   :  { %248 = vmatpush.msk.msrb.mxu2 %vm247_vm4, %v176_v50 }
 0x131   :  { %250 = vmatpush.msk.msrb.mxu2 %vm249_vm6, %v175_v47 }
 0x133   :  { %252 = vmatpush.msk.msrb.mxu2 %vm251_vm8, %v174_v49 }
 0x135   :  { %254 = vmatpush.msk.msrb.mxu2 %vm253_vm9, %v173_v51 }
 0x136   :  { %255 = vmatmul.msk.f32.vlgmr.msrb.gmra.mxu2 %vm131_vm1, %v185_v52 }
 0x1b9   :  { %v212_v54 = vpop.f32.mrf.mxu2 }
 0x1ba   :  { %v213_v55 = vadd.f32 %v212_v54, %v190_v53 }
 0x1bc   :  { %vm215_vm10 = vcmp.ne.f32.partialorder %v213_v55, %v213_v55 }
 0x1bd   :  { %v216_v56 = vsel %vm215_vm10, 0.0, %v213_v55 }
 0x1be   :  { %vm217_vm11 = vcmp.eq.f32.partialorder %v216_v56, inf }
 0x1bf   :  { %v218_v57 = vsel %vm217_vm11, 3.4028235e+38, %v216_v56 }
 0x1c0   :  { %vm219_vm13 = vcmp.eq.f32.partialorder %v218_v57, -inf }
 0x1c1   :  { %v220_v58 = vsel %vm219_vm13, -3.4028235e+38, %v218_v57 }
 0x1c2   :  { %222 = vst.msk [vmem:[#allocation2] sm:$0x1f] %vm221_vm12, %v220_v58 }
 0x1c3   :  { %233 = dma.vmem_to_hbm [thread:$0]  %s229_s12, 128, %s231_s15, [#allocation3]  }
 0x1c4   :  { %295 = dma.done.wait [#allocation3], 128  }
 0x1c5   :  { %296 = vsyncadd [#allocation3], 4294967168 }
 0x1c6   :  { %238 = vsyncpa [#allocation3], 1 }

</bundles_post_ra>
